<compile_context>
chip_gen: v5e
topology: v5e:2x2
jax: 0.10.0
libtpu: 0.0.40
codegen_flags: <defaults>
</compile_context>

<pallas_src>
import math

import jax
import jax.numpy as jnp
from jax import lax
from jax.experimental import pallas as pl
from jax.experimental.pallas import tpu as pltpu

_INV_SQRT2 = 1.0 / math.sqrt(2.0)


def _bert_image_intermediate_kernel(x_ref, w_ref, b_ref, o_ref):
    # (tm, K) @ (K, n) on the MXU with f32 accumulate, then bias + exact gelu.
    h = jnp.dot(x_ref[...], w_ref[...], preferred_element_type=jnp.float32)
    h = h + b_ref[...].astype(jnp.float32)
    g = h * 0.5 * (1.0 + lax.erf(h * _INV_SQRT2))
    o_ref[...] = g.astype(o_ref.dtype)


def _round_up(x, m):
    return ((x + m - 1) // m) * m


def _vmem_capacity_bytes():
    try:
        info = pltpu.get_tpu_info()
        cap = getattr(info, "vmem_capacity_bytes", None)
        if cap:
            return int(cap)
    except Exception:
        pass
    return 64 << 20  # conservative fallback (v7x per-TC physical VMEM)


def bert_image_intermediate(x, w, b):
    """x: [B, S, H]; w: [H, I]; b: [I] -> [B, S, I] = gelu(x @ w + b)."""
    B, S, H = x.shape
    I = w.shape[1]
    M = B * S
    x2 = x.reshape(M, H)
    b2 = b.reshape(1, I)
    itemsize = jnp.dtype(x.dtype).itemsize

    # Generation-aware VMEM budget; leave ~16 MiB for Mosaic scratch/semaphores.
    budget = max(_vmem_capacity_bytes() - (16 << 20), 16 << 20)

    w_bytes = H * I * itemsize
    b_bytes = I * itemsize
    M8 = _round_up(M, 8)
    # Cap tm near ceil(M/2) so a v7x 2-TC megacore always gets >= 2 blocks.
    tm_cap = max(min(M8, _round_up(pl.cdiv(M, 2), 8)), 8)

    def resident_ws(tm_):
        # Conservative: count W / bias as double-buffered even though their
        # constant index_map means Pallas only DMAs them once.
        return 2 * ((tm_ * H + tm_ * I) * itemsize + w_bytes + b_bytes)

    tm = None
    for cand in (8, 16, 32, 64, 128, 256, 512, 1024):
        if cand > tm_cap:
            break
        if resident_ws(cand) <= budget:
            tm = cand

    if tm is not None:
        # ---- Primary path: weight + bias fully VMEM-resident, 1-D grid. ----
        grid = (pl.cdiv(M, tm),)
        in_specs = [
            pl.BlockSpec((tm, H), lambda i: (i, 0)),   # x row block, full K
            pl.BlockSpec((H, I), lambda i: (0, 0)),    # W resident: 1 HBM read
            pl.BlockSpec((1, I), lambda i: (0, 0)),    # bias resident
        ]
        out_specs = pl.BlockSpec((tm, I), lambda i: (i, 0))
        dims = ("parallel",)
        working_set = resident_ws(tm)
        bytes_accessed = (M * H + H * I + I + M * I) * itemsize
    else:
        # ---- Fallback: W does not fit in VMEM -> 2-D full-K grid. ----------
        tn = min(512, _round_up(I, 128))
        tm = min(512, M8)

        def tiled_ws(tm_, tn_):
            return 2 * (tm_ * H + H * tn_ + tn_ + tm_ * tn_) * itemsize

        while tiled_ws(tm, tn) > budget and (tm > 8 or tn > 128):
            if tn >= tm and tn > 128:
                tn = _round_up(max(tn // 2, 128), 128)
            elif tm > 8:
                tm = _round_up(max(tm // 2, 8), 8)
            else:
                break

        nm, nn = pl.cdiv(M, tm), pl.cdiv(I, tn)
        # Re-stream whichever operand costs fewer HBM bytes; the other one is
        # held constant along the inner grid axis.
        if (nn - 1) * M * H <= (nm - 1) * H * I:
            grid = (nn, nm)  # inner axis = rows: W constant, x re-streamed
            in_specs = [
                pl.BlockSpec((tm, H), lambda j, i: (i, 0)),
                pl.BlockSpec((H, tn), lambda j, i: (0, j)),
                pl.BlockSpec((1, tn), lambda j, i: (0, j)),
            ]
            out_specs = pl.BlockSpec((tm, tn), lambda j, i: (i, j))
            bytes_accessed = (nn * M * H + H * I + I + M * I) * itemsize
        else:
            grid = (nm, nn)  # inner axis = cols: x constant, W re-streamed
            in_specs = [
                pl.BlockSpec((tm, H), lambda i, j: (i, 0)),
                pl.BlockSpec((H, tn), lambda i, j: (0, j)),
                pl.BlockSpec((1, tn), lambda i, j: (0, j)),
            ]
            out_specs = pl.BlockSpec((tm, tn), lambda i, j: (i, j))
            bytes_accessed = (M * H + nm * H * I + I + M * I) * itemsize
        dims = ("parallel", "parallel")
        working_set = tiled_ws(tm, tn)

    vmem_limit = int(min(max(working_set + (4 << 20), 32 << 20), budget))

    cost = pl.CostEstimate(
        flops=2 * M * H * I,
        transcendentals=M * I,          # one erf per output element
        bytes_accessed=int(bytes_accessed),
    )

    out = pl.pallas_call(
        _bert_image_intermediate_kernel,
        out_shape=jax.ShapeDtypeStruct((M, I), x.dtype),
        grid_spec=pltpu.PrefetchScalarGridSpec(
            num_scalar_prefetch=0,
            grid=grid,
            in_specs=in_specs,
            out_specs=out_specs,
        ),
        compiler_params=pltpu.CompilerParams(
            dimension_semantics=dims,
            vmem_limit_bytes=vmem_limit,
        ),
        cost_estimate=cost,
    )(x2, w, b2)

    return out.reshape(B, S, I)


if __name__ == "__main__":
    # Small config consistent with the module (nn.Linear(v_hidden, v_intermediate)):
    #   hidden_states [batch, num_regions, v_hidden_size]
    batch, seq = 2, 8
    v_hidden_size = 32
    v_intermediate_size = 128

    key = jax.random.PRNGKey(0)
    kx, kw, kb = jax.random.split(key, 3)

    x = jax.random.normal(kx, (batch, seq, v_hidden_size), dtype=jnp.float32)
    w = jax.random.normal(kw, (v_hidden_size, v_intermediate_size), dtype=jnp.float32) * 0.05
    b = jax.random.normal(kb, (v_intermediate_size,), dtype=jnp.float32) * 0.1

    out = bert_image_intermediate(x, w, b)
    jax.block_until_ready(out)

    # Plain-JAX reference (same default matmul precision as the kernel).
    h = jnp.dot(x.reshape(-1, v_hidden_size), w, preferred_element_type=jnp.float32) + b
    ref = (h * 0.5 * (1.0 + lax.erf(h * _INV_SQRT2))).reshape(
        batch, seq, v_intermediate_size)

    assert out.shape == ref.shape
    assert jnp.allclose(out, ref, atol=2e-3, rtol=2e-3), "mismatch vs reference"
    print("KERNEL_OK")
</pallas_src>

<mosaic_0001>
module attributes {stable_mosaic.version = 11 : i64} {
  func.func @_bert_image_intermediate_kernel(%arg0: i32, %arg1: memref<8x32xf32, #tpu.memory_space<vmem>>, %arg2: memref<32x128xf32, #tpu.memory_space<vmem>>, %arg3: memref<1x128xf32, #tpu.memory_space<vmem>>, %arg4: memref<8x128xf32, #tpu.memory_space<vmem>>) attributes {dimension_semantics = [#tpu.dimension_semantics<parallel>], iteration_bounds = array<i64: 2>, scalar_prefetch = 0 : i64, scratch_operands = 0 : i64, tpu.core_type = #tpu.core_type<tc>, window_params = [{transform_indices = @transform_0, window_bounds = array<i64: 8, 32>}, {pipeline_mode = #tpu.pipeline_mode<synchronous>, transform_indices = @transform_1, window_bounds = array<i64: 32, 128>}, {pipeline_mode = #tpu.pipeline_mode<synchronous>, transform_indices = @transform_2, window_bounds = array<i64: 1, 128>}, {transform_indices = @transform_3, window_bounds = array<i64: 8, 128>}]} {
    %c0 = arith.constant 0 : index
    %c0_0 = arith.constant 0 : index
    %0 = vector.load %arg1[%c0, %c0_0] : memref<8x32xf32, #tpu.memory_space<vmem>>, vector<8x32xf32>
    %c0_1 = arith.constant 0 : index
    %c0_2 = arith.constant 0 : index
    %1 = vector.load %arg2[%c0_1, %c0_2] : memref<32x128xf32, #tpu.memory_space<vmem>>, vector<32x128xf32>
    %cst = arith.constant dense<0.000000e+00> : vector<8x128xf32>
    %2 = tpu.matmul %0, %1, %cst {dimension_numbers = #tpu.dot_dimension_numbers<[1], [0], [0], [1], [0, 0, 1, 1], [], []>} : vector<8x32xf32>, vector<32x128xf32>, vector<8x128xf32> -> vector<8x128xf32>
    %c0_3 = arith.constant 0 : index
    %c0_4 = arith.constant 0 : index
    %3 = vector.load %arg3[%c0_3, %c0_4] : memref<1x128xf32, #tpu.memory_space<vmem>>, vector<1x128xf32>
    %4 = vector.broadcast %3 : vector<1x128xf32> to vector<8x128xf32>
    %5 = arith.addf %2, %4 : vector<8x128xf32>
    %cst_5 = arith.constant 5.000000e-01 : f32
    %6 = vector.broadcast %cst_5 : f32 to vector<8x128xf32>
    %7 = arith.mulf %5, %6 : vector<8x128xf32>
    %cst_6 = arith.constant 0.707106769 : f32
    %8 = vector.broadcast %cst_6 : f32 to vector<8x128xf32>
    %9 = arith.mulf %5, %8 : vector<8x128xf32>
    %10 = math.erf %9 : vector<8x128xf32>
    %cst_7 = arith.constant 1.000000e+00 : f32
    %11 = vector.broadcast %cst_7 : f32 to vector<8x128xf32>
    %12 = arith.addf %11, %10 : vector<8x128xf32>
    %13 = arith.mulf %7, %12 : vector<8x128xf32>
    %c0_8 = arith.constant 0 : index
    %c0_9 = arith.constant 0 : index
    %14 = vector.load %arg4[%c0_8, %c0_9] : memref<8x128xf32, #tpu.memory_space<vmem>>, vector<8x128xf32>
    tpu.vector_store %arg4[%c0_8, %c0_9], %13 {strides = array<i32>} : memref<8x128xf32, #tpu.memory_space<vmem>>, vector<8x128xf32>,
    return
  }
  func.func @transform_0(%arg0: i32) -> (i32, i32) {
    %c0_i32 = arith.constant 0 : i32
    %c0_i32_0 = arith.constant 0 : i32
    return %arg0, %c0_i32 : i32, i32
  }
  func.func @transform_1(%arg0: i32) -> (i32, i32) {
    %c0_i32 = arith.constant 0 : i32
    %c0_i32_0 = arith.constant 0 : i32
    %c0_i32_1 = arith.constant 0 : i32
    return %c0_i32, %c0_i32_0 : i32, i32
  }
  func.func @transform_2(%arg0: i32) -> (i32, i32) {
    %c0_i32 = arith.constant 0 : i32
    %c0_i32_0 = arith.constant 0 : i32
    %c0_i32_1 = arith.constant 0 : i32
    return %c0_i32, %c0_i32_0 : i32, i32
  }
  func.func @transform_3(%arg0: i32) -> (i32, i32) {
    %c0_i32 = arith.constant 0 : i32
    %c0_i32_0 = arith.constant 0 : i32
    return %arg0, %c0_i32 : i32, i32
  }
}

</mosaic_0001>

<bundles_post_ra>
// kernel: tpu_custom_call.1
= control target key start
LH: loop header
LB: loop body
LE: loop exit
PB: predicated region body
PF: predicated region fallthrough
CT: control target
= control target key end

     0   :  { %8 = vsyncpa [#allocation3], 0  ;;  %s755_s0 = inlined_call_operand.hbm [shape: f32[16,32], index: 0, kind: input, shape index: {}]   ;;  %s756_s1 = inlined_call_operand.hbm [shape: f32[32,128], index: 1, kind: input, shape index: {}]   ;;  %s757_s2 = inlined_call_operand.vmem [shape: f32[1,128], index: 2, kind: input, shape index: {}]   ;;  %s758_s3 = inlined_call_operand.hbm [shape: f32[16,128], index: 3, kind: output, shape index: {}]  }
   0x1   :  { %10 = vsyncpa [#allocation3 + $0x1], 0 }
   0x2   :  { %11 = vsyncpa [#allocation6], 0 }
   0x3   :  { %12 = vsyncpa [#allocation4], 0 }
   0x4   :  { %14 = vsyncpa [#allocation4 + $0x1], 0  ;;  %s612_s12 = smov 0   ;;  %s614_s13 = smov 0  }
   0x5   :  { %s616_s14 = smov 0   ;;  %s618_s15 = smov 0  }
   0x6 LB: > { %s130_s18 = sshll.u32 %s756_s1, 4  ;;  %s636_s19 = sadd.s32 4294967295, %s587_s15   ;;  %s587_s15 = sphi %s618_s15, %s768_s15   ;;  %s583_s14 = sphi %s616_s14, %s767_s14   ;;  %s579_s13 = sphi %s614_s13, %s766_s13   ;;  %s575_s12 = sphi %s612_s12, %s765_s12   ;;  %s131_s18 = int_to_ptr.hbm [resolvable:$true] %s130_s18 }
   0x7   : > { %p380_p0 = scmp.ge.s32.totalorder %s587_s15, 1  ;;  %p41_p1 = scmp.eq.s32.totalorder %s636_s19, 0 }
   0x8   : > { %p119_p2 = scmp.lt.s32.totalorder %s587_s15, 3  ;;  %s589_s21 = smov [#allocation5]  }
   0x9   : > { %s132_s22 = sshll.u32 %s589_s21, 4  ;;  %s590_s23 = smov 128   ;;  %s133_s22 = int_to_ptr.vmem [resolvable:$true] %s132_s22 }
   0xa   : > { %p641_p3 = pnand %p380_p0, %p119_p2  ;;  %s591_s24 = smov 8  }
   0xb   : > { %s379_s25 = sadd.s32 4294967294, %s587_s15   ;;  %s652_s26 = sadd.s32 1, %s587_s15  }
   0xc   : > { %p403_p4 = pneg %p641_p3  ;;  %s27_s27 = sadd.s32 1, %s583_s14 }
   0xd   : > { %s24_s28 = ssub.s32 %s587_s15, %s652_s26  ;;  %p34_p7 = scmp.ne.s32.totalorder %s583_s14, %s579_s13 }
   0xe   : > { %p404_p6 = pnand %p403_p4, %p41_p1  ;;  %p25_p8 = scmp.eq.s32.totalorder %s24_s28, 0 }
   0xf   : > { %p35_p9 = scmp.eq.s32.totalorder %s587_s15, 0  ;;  %p40_p10 = scmp.ne.s32.totalorder %s579_s13, %s575_s12 }
  0x10   : > { %406 = dma.hbm_to_vmem [thread:$0]  (!%p404_p6), %s131_s18, 512, %s133_s22, [#allocation6], %s590_s23, %s590_s23, %s591_s24  }
  0x11   : > { %p106_p11 = scmp.eq.s32.totalorder %s636_s19, 1  ;;  %p668_p12 = por %p41_p1, %p40_p10 }
  0x12   : > { %s664_s29 = scalar_select %p25_p8, %s583_s14, %s27_s27  }
  0x13   : > { %p672_p13 = por %p106_p11, %p34_p7  ;;  %p112_p0 = scmp.eq.s32.totalorder %s379_s25, 1 }
  0x14   : > { %p36_p2 = por %p35_p9, %p34_p7  ;;  %s149_s5 = sand.u32 1, %s583_s14  }
  0x15   : > { %p677_p4 = por %p112_p0, %p40_p10  ;;  %p416_p6 = scmp.lt.s32.totalorder %s587_s15, 2 }
  0x16   : > { %s383_s7 = sshll.u32 %s149_s5, 3  ;;  %s384_s8 = sshll.u32 %s587_s15, 3 }
  0x17   : > { %s157_s11 = scalar_lea.hbm %s755_s0, %s384_s8  ;;  %s153_s17 = scalar_lea.vmem [#allocation2], %s383_s7 }
  0x18   : > { %s159_s16 = sshll.u32 %s157_s11, 4  ;;  %s161_s18 = sshll.u32 %s153_s17, 4  ;;  %s160_s16 = int_to_ptr.hbm [resolvable:$true] %s159_s16  ;;  %s162_s18 = int_to_ptr.vmem [resolvable:$true] %s161_s18 }
  0x19   : > { %p686_p8 = pnand %p416_p6, %p36_p2  ;;  %s150_s22 = scalar_lea.sflag [#allocation3], %s149_s5 }
  0x1a   : > { %s487_s23 = sshra.s32 %s160_s16, 4  ;;  %s494_s28 = scalar_lea.hbm %s755_s0, 16  ;;  %s488_s23 = int_to_ptr.hbm [resolvable:$true] %s487_s23 }
  0x1b   : > { %s489_s24 = scalar_lea.hbm %s488_s23, 8  ;;  %p491_p9 = pneg %p686_p8 }
  0x1c   : > { %p490_p7 = scmp.ne.s32.totalorder %s488_s23, %s489_s24  ;;  %p495_p0 = scmp.lt.s32.totalorder %s488_s23, %s755_s0 }
  0x1d   : > { %p496_p2 = scmp.lt.s32.totalorder %s494_s28, %s489_s24 }
  0x1e   : > { %p492_p10 = pnand %p491_p9, %p490_p7 }
  0x1f   : > { %p497_p6 = por %p496_p2, %p495_p0 }
  0x20   : > { %p493_p11 = pneg %p492_p10 }
  0x22   : > { %p498_p5 = pnand %p497_p6, %p493_p11 }
  0x24   : > { %501 = shalt.err (!%p498_p5)
}
  0x25   : > { %410 = dma.hbm_to_vmem [thread:$0]  (!%p686_p8), %s160_s16, 128, %s162_s18, %s150_s22  }
  0x26   : > { %170 = sbr.rel (%p641_p3) target bundleno = 236 (0xec), region = 32  ;;  %s703_s5 = sand.u32 (!%p641_p3), 1, %s579_s13  }
  0x27   : > { %s386_s9 = sshll.u32 (!%p641_p3), %s703_s5, 3  ;;  %s173_s10 = scalar_lea.sflag (!%p641_p3), [#allocation3], %s703_s5 }
  0x28   : > { %s176_s11 = scalar_lea.vmem (!%p641_p3), [#allocation2], %s386_s9 }
  0x2b   : > { %562 = dma.done.wait (%p668_p12), %s173_s10, 128  }
  0x2c   : > { %564 = vsyncadd (%p668_p12), %s173_s10, 4294967168 }
  0x2d   : > { %566 = dma.done.wait (%p41_p1), [#allocation6], 512  }
  0x2e   : > { %568 = vsyncadd (%p41_p1), [#allocation6], 4294966784  ;;  %v209_v0 = vld [vmem:[#allocation5 + $0x18] sm:$0xff]  ;;  %v208_v1 = vld [vmem:[#allocation5 + $0x10] sm:$0xff]  ;;  %vm214_vm0 = vcmask 261120   ;;  %s392_s16 = sshll.u32 %s636_s19, 3 }
  0x2f   : > { %230 = vmatpush.msra.mxu0 %v209_v0  ;;  %v207_v2 = vld [vmem:[#allocation5 + $0x8] sm:$0xff]  ;;  %v206_v3 = vld [vmem:[#allocation5] sm:$0xff]  ;;  %v205_v4 = vld [vmem:[%s176_s11] sm:$0xff]  ;;  %s294_s21 = scalar_lea.hbm %s758_s3, %s392_s16  ;;  %s204_s22 = scalar_lea.vmem [#allocation7], %s386_s9 }
  0x30   : > { %v454_v5 = vld [vmem:[%s757_s2] ss:$0 sm:$0xff]  ;;  %s296_s23 = sshll.u32 %s204_s22, 4  ;;  %s298_s24 = sshll.u32 %s294_s21, 4  ;;  %s297_s23 = int_to_ptr.vmem [resolvable:$true] %s296_s23  ;;  %s299_s24 = int_to_ptr.hbm [resolvable:$true] %s298_s24 }
  0x31   : > { %231 = vmatpush.msra.mxu0 %v208_v1  ;;  %s284_s19 = scalar_lea.sflag [#allocation4], %s703_s5  ;;  %s531_s25 = sshra.s32 %s299_s24, 4  ;;  %s532_s25 = int_to_ptr.hbm [resolvable:$true] %s531_s25 }
  0x32   : > { %s533_s27 = scalar_lea.hbm %s532_s25, 8  ;;  %s537_s8 = scalar_lea.hbm %s758_s3, 16 }
  0x33   : > { %232 = vmatpush.msra.mxu0 %v207_v2  ;;  %p534_p1 = scmp.ne.s32.totalorder %s532_s25, %s533_s27  ;;  %p538_p12 = scmp.lt.s32.totalorder %s532_s25, %s758_s3 }
  0x34   : > { %p539_p8 = scmp.lt.s32.totalorder %s537_s8, %s533_s27 }
  0x35   : > { %233 = vmatpush.msra.mxu0 %v206_v3  ;;  %p535_p3 = pnand %p534_p1, %p672_p13 }
  0x36   : > { %389 = vmatmul.msk.f32.vlgmr.msra.gmra.mxu0 %vm214_vm0, %v205_v4  ;;  %p540_p7 = por %p539_p8, %p538_p12 }
  0x37   : > { %p536_p5 = pneg %p535_p3 }
  0x39   : > { %p541_p9 = pnand %p540_p7, %p536_p5 }
  0xb3   : > { %v235_v6 = vpop.f32.mrf.mxu0 }
  0xb4   : > { %v236_v7 = vadd.f32 %v454_v5, %v235_v6 }
  0xb6   : > { %v239_v8 = vmul.f32 0.70710677, %v236_v7  ;;  %v238_v44 = vmul.f32 0.5, %v236_v7 }
  0xb8   : > { %v240_v9 = vmul.f32 %v239_v8, %v239_v8 }
  0xba   : > { %v241_v10 = vmin.f32 %v240_v9, 16.0 }
  0xbc   : > { %v242_v11 = vmul.f32 2.1237322e-06, %v241_v10  ;;  %v253_v12 = vmul.f32 3.8918573e-05, %v241_v10 }
  0xbe   : > { %v243_v13 = vadd.f32 0.00028619796, %v242_v11  ;;  %v254_v14 = vadd.f32 0.001143296, %v253_v12 }
  0xc0   : > { %v244_v15 = vmul.f32 %v243_v13, %v241_v10  ;;  %v255_v16 = vmul.f32 %v254_v14, %v241_v10 }
  0xc2   : > { %v256_v17 = vadd.f32 0.014752088, %v255_v16  ;;  %v245_v18 = vadd.f32 0.0036580483, %v244_v15 }
  0xc4   : > { %v257_v19 = vmul.f32 %v256_v17, %v241_v10  ;;  %v246_v21 = vmul.f32 %v245_v18, %v241_v10 }
  0xc6   : > { %v258_v20 = vadd.f32 0.112945676, %v257_v19  ;;  %v247_v24 = vadd.f32 0.05243302, %v246_v21 }
  0xc8   : > { %v259_v22 = vmul.f32 %v258_v20, %v241_v10  ;;  %v248_v27 = vmul.f32 %v247_v24, %v241_v10 }
  0xca   : > { %v260_v23 = vadd.f32 0.4994258, %v259_v22  ;;  %v249_v28 = vadd.f32 0.18741608, %v248_v27 }
  0xcc   : > { %v261_v25 = vmul.f32 %v260_v23, %v241_v10  ;;  %v250_v30 = vmul.f32 %v249_v28, %v241_v10 }
  0xce   : > { %v262_v26 = vadd.f32 1.0, %v261_v25  ;;  %v251_v34 = vadd.f32 1.1283791, %v250_v30 }
  0xd0   : > { %455 = vrcp.f32 %v262_v26  ;;  %v274_v33 = vand.u32 2147483648, %v262_v26  ;;  %v272_v36 = vand.u32 2147483647, %v262_v26  ;;  %vm268_vm2 = vweird.f32 %v262_v26 }
  0xd1   : > { %v252_v39 = vmul.f32 %v251_v34, %v239_v8 }
  0xd2   : > { %v275_v38 = vor.u32 1.1754944e-38, %v274_v33  ;;  %vm273_vm4 = vcmp.eq.f32.partialorder %v272_v36, 8.507059e+37 }
  0xd6   : > { %v456_v29 = vpop.eup %455 }
  0xd7   : > { %v264_v31 = vmul.f32 %v456_v29, %v262_v26  ;;  %vm269_vm1 = vweird.f32 %v456_v29 }
  0xd8   : > { %vm270_vm3 = vmor %vm268_vm2, %vm269_vm1 }
  0xd9   : > { %v265_v32 = vsub.f32 1.0, %v264_v31 }
  0xdb   : > { %v266_v35 = vmul.f32 %v456_v29, %v265_v32 }
  0xdd   : > { %v267_v37 = vadd.f32 %v456_v29, %v266_v35 }
  0xdf   : > { %v271_v40 = vsel %vm270_vm3, %v456_v29, %v267_v37 }
  0xe0   : > { %v276_v41 = vsel %vm273_vm4, %v275_v38, %v271_v40 }
  0xe1   : > { %v277_v42 = vmul.f32 %v276_v41, %v252_v39 }
  0xe3   : > { %v390_v43 = vclamps-f32 %v277_v42, 1.0 }
  0xe5   : > { %v280_v45 = vadd.f32 1.0, %v390_v43 }
  0xe7   : > { %v281_v46 = vmul.f32 %v280_v45, %v238_v44 }
  0xe9   : > { %282 = vst [vmem:[%s204_s22] sm:$0xff] %v281_v46 }
  0xea   : > { %544 = shalt.err (!%p541_p9)
}
  0xeb   : > { %401 = dma.vmem_to_hbm [thread:$0]  (%p672_p13), %s297_s23, 128, %s299_s24, %s284_s19  }
  0xec PF: > { %s310_s5 = sand.u32 1, %s575_s12   ;;  %p764_p10 = scmp.ge.s32.totalorder %s587_s15, 2 }
  0xed   : > { %s311_s11 = scalar_lea.sflag [#allocation4], %s310_s5 }
  0xee   : > { %p412_p11 = pnand %p764_p10, %p677_p4 }
  0xf0   : > { %p413_p0 = pneg %p412_p11 }
  0xf2   : > { %570 = dma.done.wait (%p413_p0), %s311_s11, 128  }
  0xf3   : > { %572 = vsyncadd (%p413_p0), %s311_s11, 4294967168  ;;  %p17_p2 = scmp.ge.s32.totalorder %s652_s26, 4   ;;  %s765_s12 = smov %s579_s13 }
  0xf4   : > { %s766_s13 = smov %s583_s14  ;;  %s767_s14 = smov %s664_s29 }
  0xf5   : > { %s768_s15 = smov %s652_s26  ;;  %19 = sbr.rel (!%p17_p2) target bundleno = 6 (0x6), region = 81 }
  0xfa   :  { %317 = vsyncpa [#allocation3], 1 }
  0xfb   :  { %319 = vsyncpa [#allocation3 + $0x1], 1 }
  0xfc   :  { %320 = vsyncpa [#allocation6], 1 }
  0xfd   :  { %321 = vsyncpa [#allocation4], 1 }
  0xfe   :  { %323 = vsyncpa [#allocation4 + $0x1], 1 }

</bundles_post_ra>
